<compile_context>
chip_gen: v7x
topology: tpu7x:2x2x1
jax: 0.10.0
libtpu: 0.0.40
codegen_flags: <defaults>
</compile_context>

<pallas_src>
import jax
import jax.numpy as jnp
from jax.experimental import pallas as pl
from jax.experimental.pallas import tpu as pltpu

LANES = 128
SUBLANES = 8
ROW_ALIGN = 16            # slab row alignment legal for f32 and bf16 packing
STRIP_ROWS = 256          # 256x128 f32 = 128 KiB of temporaries per strip
NUM_CORE_SPLITS = 2       # leading "parallel" axis -> 2 TensorCores on v7x
VMEM_LIMIT_BYTES = 40 * 1024 * 1024   # safely under v7x's 64 MiB physical VMEM


def _make_kernel(*, weighted, tile_rows, nb, bpc,
                 n_full_rows, n_tail_lanes, n_full_strips, rem_rows):
    """Build the kernel body. All config is static (baked in via closure)."""

    def kernel(*refs):
        if weighted:
            pred_ref, gt_ref, w_ref, out_ref = refs
        else:
            pred_ref, gt_ref, out_ref = refs
            w_ref = None

        c = pl.program_id(0)          # core-split index ("parallel")
        i = pl.program_id(1)          # block index within this core ("arbitrary")
        block_id = c * bpc + i        # global block index along the row axis

        @pl.when(i == 0)
        def _():
            out_ref[...] = jnp.zeros_like(out_ref)

        def one_strip(r0, strip_rows, masked):
            x = pred_ref[pl.ds(r0, strip_rows), :].astype(jnp.float32)
            y = gt_ref[pl.ds(r0, strip_rows), :].astype(jnp.float32)
            # Numerically stable BCE-with-logits (PyTorch formulation).
            # TODO(synk): on v6e/v7x the exp/log1p pair could run in bf16 on the
            # EUP (2x transcendental throughput) if tolerance allows; keep f32
            # everywhere for v5e (no bf16 EUP) and accuracy.
            per = jnp.maximum(x, 0.0) - x * y + jnp.log1p(jnp.exp(-jnp.abs(x)))
            if w_ref is not None:
                per = per * w_ref[pl.ds(r0, strip_rows), :].astype(jnp.float32)
            if masked:
                # Row/lane-based bound (not a flat element index) so the compare
                # stays safely inside int32 even for huge inputs.
                row = jax.lax.broadcasted_iota(jnp.int32, (strip_rows, LANES), 0)
                lane = jax.lax.broadcasted_iota(jnp.int32, (strip_rows, LANES), 1)
                grow = block_id * tile_rows + r0 + row
                ok = (grow < n_full_rows) | (
                    (grow == n_full_rows) & (lane < n_tail_lanes))
                per = jnp.where(ok, per, 0.0)
            # vreg-wise partial sums (pure VPU adds) into the resident (8,128)
            # output block; the final cross-lane reduce happens in the wrapper.
            out_ref[...] += per.reshape(-1, SUBLANES, LANES).sum(axis=0)

        def accumulate(masked):
            if n_full_strips > 0:
                @pl.loop(0, n_full_strips)
                def _(s):
                    one_strip(pl.multiple_of(s * STRIP_ROWS, STRIP_ROWS),
                              STRIP_ROWS, masked)
            if rem_rows > 0:
                one_strip(n_full_strips * STRIP_ROWS, rem_rows, masked)

        # Interior blocks: no masking -> hot path is pure streaming + EUP + adds.
        @pl.when(block_id < nb - 1)
        def _():
            accumulate(masked=False)

        # Last real block: mask wrapper zero-padding and any partial-block
        # garbage past the real data. block_id > nb - 1 only happens on the
        # clamped dummy step (odd block count, two-core split) and contributes
        # nothing.
        @pl.when(block_id == nb - 1)
        def _():
            accumulate(masked=True)

    return kernel


def _as_slab(x):
    """Flatten to a lane-dense (-1, 128) slab with rows padded to ROW_ALIGN.

    The reshape of a contiguous array is free; a pad copy only happens when the
    element count is not already a multiple of ROW_ALIGN * 128.
    """
    flat = x.reshape(-1)
    pad = (-flat.shape[0]) % (ROW_ALIGN * LANES)
    if pad:
        flat = jnp.pad(flat, (0, pad))
    return flat.reshape(-1, LANES)


def bce_with_logits_loss(pred, gt, weight=None, *, weighted_loss=True):
    """Mirrors BCEWithLogitsLoss(weighted_loss).forward(pred, gt, {'weight': weight})."""
    n = pred.size
    use_weight = weighted_loss and weight is not None
    w_scalar = None
    if use_weight:
        weight = jnp.asarray(weight)
        if weight.size == 1:
            # mean(w * l) == w * mean(l): fold scalar weights outside the kernel
            # (no third HBM stream, no broadcast pass).
            w_scalar = weight.reshape(()).astype(jnp.float32)
            use_weight = False
        elif weight.shape != pred.shape:
            # TODO(synk): keep small broadcastable (e.g. per-channel) weights
            # SMEM/VMEM-resident and index them in-kernel instead of
            # materializing a full-size HBM copy.
            weight = jnp.broadcast_to(weight, pred.shape)

    slabs = [_as_slab(pred), _as_slab(gt)]
    if use_weight:
        slabs.append(_as_slab(weight))
    streams = len(slabs)
    rows = slabs[0].shape[0]                      # multiple of ROW_ALIGN
    itemsize = max(int(s.dtype.itemsize) for s in slabs)

    # Tile sizing: mem-bound kernel -> biggest tiles that keep
    # streams x 2 (double-buffer) x tile comfortably inside the VMEM budget.
    # f32: 8192 rows (4 MiB) unweighted / 4096 rows (2 MiB) weighted; bf16: 2x rows.
    target_tile_bytes = (4 << 20) if streams == 2 else (2 << 20)
    target_rows = max(
        STRIP_ROWS,
        (target_tile_bytes // (LANES * itemsize)) // STRIP_ROWS * STRIP_ROWS)
    tile_rows = min(target_rows, rows)

    nb = pl.cdiv(rows, tile_rows)                 # total row blocks
    cores = NUM_CORE_SPLITS if nb >= NUM_CORE_SPLITS else 1
    bpc = pl.cdiv(nb, cores)                      # blocks per core split
    n_full_strips, rem_rows = divmod(tile_rows, STRIP_ROWS)

    if cores == 1 or nb % cores == 0:
        in_index = lambda c, i: (c * bpc + i, 0)
    else:
        # Odd block count: the second core has one dummy step; clamp its block
        # index to a valid block (the kernel skips its contribution).
        in_index = lambda c, i: (jnp.minimum(c * bpc + i, nb - 1), 0)

    in_spec = pl.BlockSpec((tile_rows, LANES), in_index)
    # Lane-dense, vreg-shaped per-core partial-sum block (acts as accumulator).
    out_spec = pl.BlockSpec((SUBLANES, LANES), lambda c, i: (c, 0))

    kernel = _make_kernel(
        weighted=use_weight, tile_rows=tile_rows, nb=nb, bpc=bpc,
        n_full_rows=n // LANES, n_tail_lanes=n % LANES,
        n_full_strips=n_full_strips, rem_rows=rem_rows)

    bytes_accessed = sum(int(s.size) * int(s.dtype.itemsize) for s in slabs)
    partials = pl.pallas_call(
        kernel,
        out_shape=jax.ShapeDtypeStruct((cores * SUBLANES, LANES), jnp.float32),
        grid_spec=pltpu.PrefetchScalarGridSpec(
            num_scalar_prefetch=0,
            grid=(cores, bpc),
            in_specs=[in_spec] * streams,
            out_specs=out_spec,
        ),
        compiler_params=pltpu.CompilerParams(
            dimension_semantics=("parallel", "arbitrary"),
            vmem_limit_bytes=VMEM_LIMIT_BYTES),
        cost_estimate=pl.CostEstimate(
            flops=6 * n,
            transcendentals=2 * n,
            bytes_accessed=bytes_accessed + cores * SUBLANES * LANES * 4),
    )(*slabs)

    loss = jnp.sum(partials) / jnp.float32(n)
    if w_scalar is not None:
        loss = loss * w_scalar
    return loss


def _reference(pred, gt, weight=None):
    x = pred.astype(jnp.float32)
    y = gt.astype(jnp.float32)
    l = jnp.maximum(x, 0.0) - x * y + jnp.log1p(jnp.exp(-jnp.abs(x)))
    if weight is not None:
        l = l * jnp.broadcast_to(jnp.asarray(weight, jnp.float32), x.shape)
    return jnp.mean(l)


if __name__ == "__main__":
    key = jax.random.PRNGKey(0)
    k1, k2, k3, k4, k5 = jax.random.split(key, 5)

    # Vreg-aligned case (no wrapper pad): NCHW, 2*4*16*16 = 2048 elements.
    B, C, H, W = 2, 4, 16, 16
    pred = jax.random.normal(k1, (B, C, H, W), dtype=jnp.float32)
    gt = (jax.random.uniform(k2, (B, C, H, W)) > 0.5).astype(jnp.float32)
    weight = jax.random.uniform(k3, (B, C, H, W), dtype=jnp.float32) + 0.5

    loss_w = jax.block_until_ready(
        bce_with_logits_loss(pred, gt, weight, weighted_loss=True))
    loss_u = jax.block_until_ready(
        bce_with_logits_loss(pred, gt, weight, weighted_loss=False))
    ref_w = _reference(pred, gt, weight)
    ref_u = _reference(pred, gt, None)
    assert jnp.allclose(loss_w, ref_w, rtol=1e-5, atol=1e-6), (loss_w, ref_w)
    assert jnp.allclose(loss_u, ref_u, rtol=1e-5, atol=1e-6), (loss_u, ref_u)

    # Ragged case (exercises the in-kernel tail mask): 2*3*5*7 = 210 elements.
    pred_r = jax.random.normal(k4, (2, 3, 5, 7), dtype=jnp.float32)
    gt_r = (jax.random.uniform(k5, (2, 3, 5, 7)) > 0.5).astype(jnp.float32)
    loss_r = jax.block_until_ready(
        bce_with_logits_loss(pred_r, gt_r, None, weighted_loss=False))
    ref_r = _reference(pred_r, gt_r, None)
    assert jnp.allclose(loss_r, ref_r, rtol=1e-5, atol=1e-6), (loss_r, ref_r)

    # Scalar broadcastable weight (folded outside the kernel, no extra stream).
    w_s = jnp.float32(0.25)
    loss_s = jax.block_until_ready(
        bce_with_logits_loss(pred, gt, w_s, weighted_loss=True))
    ref_s = _reference(pred, gt, w_s)
    assert jnp.allclose(loss_s, ref_s, rtol=1e-5, atol=1e-6), (loss_s, ref_s)

    print("KERNEL_OK")
</pallas_src>

<mosaic_0001>
module attributes {stable_mosaic.version = 11 : i64} {
  func.func @kernel(%arg0: i32, %arg1: i32, %arg2: memref<16x128xf32, #tpu.memory_space<vmem>>, %arg3: memref<16x128xf32, #tpu.memory_space<vmem>>, %arg4: memref<16x128xf32, #tpu.memory_space<vmem>>, %arg5: memref<8x128xf32, #tpu.memory_space<vmem>>) attributes {dimension_semantics = [#tpu.dimension_semantics<parallel>, #tpu.dimension_semantics<arbitrary>], iteration_bounds = array<i64: 1, 1>, scalar_prefetch = 0 : i64, scratch_operands = 0 : i64, tpu.core_type = #tpu.core_type<tc>, window_params = [{transform_indices = @transform_0, window_bounds = array<i64: 16, 128>}, {transform_indices = @transform_1, window_bounds = array<i64: 16, 128>}, {transform_indices = @transform_2, window_bounds = array<i64: 16, 128>}, {transform_indices = @transform_3, window_bounds = array<i64: 8, 128>}]} {
    %c1_i32 = arith.constant 1 : i32
    %0 = arith.muli %arg0, %c1_i32 : i32
    %1 = arith.addi %0, %arg1 : i32
    %c0_i32 = arith.constant 0 : i32
    %2 = arith.cmpi eq, %arg1, %c0_i32 : i32
    %3 = arith.extui %2 : i1 to i32
    %c0_i32_0 = arith.constant 0 : i32
    %4 = arith.cmpi ne, %3, %c0_i32_0 : i32
    scf.if %4 {
      %cst = arith.constant 0.000000e+00 : f32
      %11 = vector.broadcast %cst : f32 to vector<8x128xf32>
      %c0 = arith.constant 0 : index
      %c0_5 = arith.constant 0 : index
      %12 = vector.load %arg5[%c0, %c0_5] : memref<8x128xf32, #tpu.memory_space<vmem>>, vector<8x128xf32>
      tpu.vector_store %arg5[%c0, %c0_5], %11 {strides = array<i32>} : memref<8x128xf32, #tpu.memory_space<vmem>>, vector<8x128xf32>,
    } else {
    }
    %c0_i32_1 = arith.constant 0 : i32
    %5 = arith.cmpi slt, %1, %c0_i32_1 : i32
    %6 = arith.extui %5 : i1 to i32
    %c0_i32_2 = arith.constant 0 : i32
    %7 = arith.cmpi ne, %6, %c0_i32_2 : i32
    scf.if %7 {
      %c0 = arith.constant 0 : index
      %c0_5 = arith.constant 0 : index
      %11 = vector.load %arg2[%c0, %c0_5] : memref<16x128xf32, #tpu.memory_space<vmem>>, vector<16x128xf32>
      %c0_6 = arith.constant 0 : index
      %c0_7 = arith.constant 0 : index
      %12 = vector.load %arg3[%c0_6, %c0_7] : memref<16x128xf32, #tpu.memory_space<vmem>>, vector<16x128xf32>
      %cst = arith.constant 0.000000e+00 : f32
      %13 = vector.broadcast %cst : f32 to vector<16x128xf32>
      %14 = arith.maximumf %11, %13 : vector<16x128xf32>
      %15 = arith.mulf %11, %12 : vector<16x128xf32>
      %16 = arith.subf %14, %15 : vector<16x128xf32>
      %17 = math.absf %11 : vector<16x128xf32>
      %cst_8 = arith.constant 0.000000e+00 : f32
      %18 = vector.broadcast %cst_8 : f32 to vector<16x128xf32>
      %19 = arith.subf %18, %17 : vector<16x128xf32>
      %20 = math.exp %19 : vector<16x128xf32>
      %21 = math.log1p %20 : vector<16x128xf32>
      %22 = arith.addf %16, %21 : vector<16x128xf32>
      %c0_9 = arith.constant 0 : index
      %c0_10 = arith.constant 0 : index
      %23 = vector.load %arg4[%c0_9, %c0_10] : memref<16x128xf32, #tpu.memory_space<vmem>>, vector<16x128xf32>
      %24 = arith.mulf %22, %23 : vector<16x128xf32>
      %c0_11 = arith.constant 0 : index
      %c0_12 = arith.constant 0 : index
      %25 = vector.load %arg5[%c0_11, %c0_12] : memref<8x128xf32, #tpu.memory_space<vmem>>, vector<8x128xf32>
      %26 = vector.shape_cast %24 : vector<16x128xf32> to vector<2x8x128xf32>
      %cst_13 = arith.constant dense<0.000000e+00> : vector<8x128xf32>
      %27 = vector.multi_reduction <add>, %26, %cst_13 [0] : vector<2x8x128xf32> to vector<8x128xf32>
      %28 = arith.addf %25, %27 : vector<8x128xf32>
      %c0_14 = arith.constant 0 : index
      %c0_15 = arith.constant 0 : index
      %29 = vector.load %arg5[%c0_14, %c0_15] : memref<8x128xf32, #tpu.memory_space<vmem>>, vector<8x128xf32>
      tpu.vector_store %arg5[%c0_14, %c0_15], %28 {strides = array<i32>} : memref<8x128xf32, #tpu.memory_space<vmem>>, vector<8x128xf32>,
    } else {
    }
    %c0_i32_3 = arith.constant 0 : i32
    %8 = arith.cmpi eq, %1, %c0_i32_3 : i32
    %9 = arith.extui %8 : i1 to i32
    %c0_i32_4 = arith.constant 0 : i32
    %10 = arith.cmpi ne, %9, %c0_i32_4 : i32
    scf.if %10 {
      %c0 = arith.constant 0 : index
      %c0_5 = arith.constant 0 : index
      %11 = vector.load %arg2[%c0, %c0_5] : memref<16x128xf32, #tpu.memory_space<vmem>>, vector<16x128xf32>
      %c0_6 = arith.constant 0 : index
      %c0_7 = arith.constant 0 : index
      %12 = vector.load %arg3[%c0_6, %c0_7] : memref<16x128xf32, #tpu.memory_space<vmem>>, vector<16x128xf32>
      %cst = arith.constant 0.000000e+00 : f32
      %13 = vector.broadcast %cst : f32 to vector<16x128xf32>
      %14 = arith.maximumf %11, %13 : vector<16x128xf32>
      %15 = arith.mulf %11, %12 : vector<16x128xf32>
      %16 = arith.subf %14, %15 : vector<16x128xf32>
      %17 = math.absf %11 : vector<16x128xf32>
      %cst_8 = arith.constant 0.000000e+00 : f32
      %18 = vector.broadcast %cst_8 : f32 to vector<16x128xf32>
      %19 = arith.subf %18, %17 : vector<16x128xf32>
      %20 = math.exp %19 : vector<16x128xf32>
      %21 = math.log1p %20 : vector<16x128xf32>
      %22 = arith.addf %16, %21 : vector<16x128xf32>
      %c0_9 = arith.constant 0 : index
      %c0_10 = arith.constant 0 : index
      %23 = vector.load %arg4[%c0_9, %c0_10] : memref<16x128xf32, #tpu.memory_space<vmem>>, vector<16x128xf32>
      %24 = arith.mulf %22, %23 : vector<16x128xf32>
      %25 = tpu.iota {dimensions = array<i32: 0>} : vector<16x128xi32>
      %26 = tpu.iota {dimensions = array<i32: 1>} : vector<16x128xi32>
      %c16_i32 = arith.constant 16 : i32
      %27 = arith.muli %1, %c16_i32 : i32
      %c0_i32_11 = arith.constant 0 : i32
      %28 = arith.addi %27, %c0_i32_11 : i32
      %29 = vector.broadcast %28 : i32 to vector<16x128xi32>
      %30 = arith.addi %29, %25 : vector<16x128xi32>
      %c16_i32_12 = arith.constant 16 : i32
      %31 = vector.broadcast %c16_i32_12 : i32 to vector<16x128xi32>
      %32 = arith.cmpi slt, %30, %31 : vector<16x128xi32>
      %c16_i32_13 = arith.constant 16 : i32
      %33 = vector.broadcast %c16_i32_13 : i32 to vector<16x128xi32>
      %34 = arith.cmpi eq, %30, %33 : vector<16x128xi32>
      %c0_i32_14 = arith.constant 0 : i32
      %35 = vector.broadcast %c0_i32_14 : i32 to vector<16x128xi32>
      %36 = arith.cmpi slt, %26, %35 : vector<16x128xi32>
      %37 = arith.andi %34, %36 : vector<16x128xi1>
      %38 = arith.ori %32, %37 : vector<16x128xi1>
      %cst_15 = arith.constant 0.000000e+00 : f32
      %39 = vector.broadcast %cst_15 : f32 to vector<16x128xf32>
      %40 = arith.select %38, %24, %39 : vector<16x128xi1>, vector<16x128xf32>
      %c0_16 = arith.constant 0 : index
      %c0_17 = arith.constant 0 : index
      %41 = vector.load %arg5[%c0_16, %c0_17] : memref<8x128xf32, #tpu.memory_space<vmem>>, vector<8x128xf32>
      %42 = vector.shape_cast %40 : vector<16x128xf32> to vector<2x8x128xf32>
      %cst_18 = arith.constant dense<0.000000e+00> : vector<8x128xf32>
      %43 = vector.multi_reduction <add>, %42, %cst_18 [0] : vector<2x8x128xf32> to vector<8x128xf32>
      %44 = arith.addf %41, %43 : vector<8x128xf32>
      %c0_19 = arith.constant 0 : index
      %c0_20 = arith.constant 0 : index
      %45 = vector.load %arg5[%c0_19, %c0_20] : memref<8x128xf32, #tpu.memory_space<vmem>>, vector<8x128xf32>
      tpu.vector_store %arg5[%c0_19, %c0_20], %44 {strides = array<i32>} : memref<8x128xf32, #tpu.memory_space<vmem>>, vector<8x128xf32>,
    } else {
    }
    return
  }
  func.func @transform_0(%arg0: i32, %arg1: i32) -> (i32, i32) {
    %c1_i32 = arith.constant 1 : i32
    %0 = arith.muli %arg0, %c1_i32 : i32
    %1 = arith.addi %0, %arg1 : i32
    %c0_i32 = arith.constant 0 : i32
    %c0_i32_0 = arith.constant 0 : i32
    return %1, %c0_i32 : i32, i32
  }
  func.func @transform_1(%arg0: i32, %arg1: i32) -> (i32, i32) {
    %c1_i32 = arith.constant 1 : i32
    %0 = arith.muli %arg0, %c1_i32 : i32
    %1 = arith.addi %0, %arg1 : i32
    %c0_i32 = arith.constant 0 : i32
    %c0_i32_0 = arith.constant 0 : i32
    return %1, %c0_i32 : i32, i32
  }
  func.func @transform_2(%arg0: i32, %arg1: i32) -> (i32, i32) {
    %c1_i32 = arith.constant 1 : i32
    %0 = arith.muli %arg0, %c1_i32 : i32
    %1 = arith.addi %0, %arg1 : i32
    %c0_i32 = arith.constant 0 : i32
    %c0_i32_0 = arith.constant 0 : i32
    return %1, %c0_i32 : i32, i32
  }
  func.func @transform_3(%arg0: i32, %arg1: i32) -> (i32, i32) {
    %c0_i32 = arith.constant 0 : i32
    %c0_i32_0 = arith.constant 0 : i32
    return %arg0, %c0_i32 : i32, i32
  }
}

</mosaic_0001>

<bundles_post_ra>
// kernel: tpu_custom_call.1
= control target key start
LH: loop header
LB: loop body
LE: loop exit
PB: predicated region body
PF: predicated region fallthrough
CT: control target
= control target key end

     0   :  { %8 = vsyncpa [#allocation3], 0  ;;  %s415_s0 = inlined_call_operand.hbm [shape: f32[16,128], index: 0, kind: input, shape index: {}]   ;;  %s416_s1 = inlined_call_operand.hbm [shape: f32[16,128], index: 1, kind: input, shape index: {}]   ;;  %s417_s2 = inlined_call_operand.hbm [shape: f32[16,128], index: 2, kind: input, shape index: {}]   ;;  %s418_s3 = inlined_call_operand.hbm [shape: f32[8,128], index: 3, kind: output, shape index: {}]  }
   0x1   :  { %9 = vsyncpa [#allocation6], 0 }
   0x2   :  { %10 = vsyncpa [#allocation4], 0  ;;  %s325_s12 = smov [#allocation5]   ;;  %s326_s14 = smov [#allocation2]  }
   0x3   :  { %s36_s13 = sshll.u32 %s325_s12, 4  ;;  %s20_s15 = sshll.u32 %s326_s14, 4  ;;  %s37_s13 = int_to_ptr.vmem [resolvable:$true] %s36_s13  ;;  %s351_s15 = int_to_ptr.vmem [resolvable:$true] %s20_s15 }
   0x4   :  { %s231_s18 = scalar_lea.hbm %s416_s1, 256 }
   0x5   :  { %p232_p0 = scmp.ne.s32.totalorder %s416_s1, %s231_s18  ;;  %p235_p1 = scmp.lt.u32.totalorder %s231_s18, %s416_s1 }
   0x7   :  { %p237_p2 = pnand %p235_p1, %p232_p0 }
   0x9   :  { %240 = shalt.err (!%p237_p2)
}
   0xa   :  { %s241_s23 = scalar_lea.vmem %s37_s13, 256  ;;  %p246_p4 = scmp.lt.s32.totalorder %s37_s13, %s37_s13 }
   0xb   :  { %p242_p3 = scmp.ne.s32.totalorder %s37_s13, %s241_s23  ;;  %p247_p5 = scmp.lt.s32.totalorder %s241_s23, %s241_s23 }
   0xd   :  { %p248_p6 = por %p247_p5, %p246_p4 }
   0xf   :  { %p249_p7 = pnand %p248_p6, %p242_p3 }
  0x11   :  { %252 = shalt.err (!%p249_p7)
}
  0x12   :  { %s327_s24 = smov 128   ;;  %s328_s25 = smov 8  }
  0x13   :  { %42 = dma.hbm_to_vmem [thread:$0]  %s416_s1, 256, %s37_s13, [#allocation6], %s327_s24, %s327_s24, %s328_s25  }
  0x14   :  { %s253_s30 = scalar_lea.hbm %s415_s0, 256 }
  0x15   :  { %p254_p8 = scmp.ne.s32.totalorder %s415_s0, %s253_s30  ;;  %p257_p9 = scmp.lt.u32.totalorder %s253_s30, %s415_s0 }
  0x17   :  { %p259_p10 = pnand %p257_p9, %p254_p8 }
  0x19   :  { %262 = shalt.err (!%p259_p10)
}
  0x1a   :  { %s263_s8 = scalar_lea.vmem %s351_s15, 256  ;;  %p268_p12 = scmp.lt.s32.totalorder %s351_s15, %s351_s15 }
  0x1b   :  { %p264_p11 = scmp.ne.s32.totalorder %s351_s15, %s263_s8  ;;  %p269_p13 = scmp.lt.s32.totalorder %s263_s8, %s263_s8 }
  0x1d   :  { %p270_p0 = por %p269_p13, %p268_p12 }
  0x1f   :  { %p271_p1 = pnand %p270_p0, %p264_p11 }
  0x21   :  { %274 = shalt.err (!%p271_p1)
}
  0x22   :  { %26 = dma.hbm_to_vmem [thread:$0]  %s415_s0, 256, %s351_s15, [#allocation3], %s327_s24, %s327_s24, %s328_s25  }
  0x23   :  { %s329_s10 = smov [#allocation7]   ;;  %s275_s14 = scalar_lea.hbm %s417_s2, 256 }
  0x24   :  { %s52_s11 = sshll.u32 %s329_s10, 4  ;;  %p276_p2 = scmp.ne.s32.totalorder %s417_s2, %s275_s14  ;;  %s53_s11 = int_to_ptr.vmem [resolvable:$true] %s52_s11 }
  0x25   :  { %p279_p3 = scmp.lt.u32.totalorder %s275_s14, %s417_s2 }
  0x27   :  { %p281_p4 = pnand %p279_p3, %p276_p2 }
  0x29   :  { %284 = shalt.err (!%p281_p4)
}
  0x2a   :  { %s285_s20 = scalar_lea.vmem %s53_s11, 256  ;;  %p290_p6 = scmp.lt.s32.totalorder %s53_s11, %s53_s11 }
  0x2b   :  { %p286_p5 = scmp.ne.s32.totalorder %s53_s11, %s285_s20  ;;  %p291_p7 = scmp.lt.s32.totalorder %s285_s20, %s285_s20 }
  0x2d   :  { %p292_p8 = por %p291_p7, %p290_p6 }
  0x2f   :  { %p293_p9 = pnand %p292_p8, %p286_p5 }
  0x31   :  { %296 = shalt.err (!%p293_p9)
}
  0x32   :  { %58 = dma.hbm_to_vmem [thread:$0]  %s417_s2, 256, %s53_s11, [#allocation6], %s327_s24, %s327_s24, %s328_s25  }
  0x33   :  { %319 = dma.done.wait [#allocation3], 256  }
  0x34   :  { %320 = vsyncadd [#allocation3], 4294967040 }
  0x35   :  { %321 = dma.done.wait [#allocation6], 512  }
  0x36   :  { %322 = vsyncadd [#allocation6], 4294966784  ;;  %v134_v0 = vld [vmem:[#allocation2] sm:$0xff]  ;;  %v135_v1 = vld [vmem:[#allocation2 + $0x8] sm:$0xff]  ;;  %s330_s2 = smov [#allocation8]  }
  0x37   :  { %v144_v2 = vand.u32 2147483647, %v134_v0  ;;  %v145_v3 = vand.u32 2147483647, %v135_v1  ;;  %v136_v14 = vld [vmem:[#allocation5] sm:$0xff]  ;;  %v137_v15 = vld [vmem:[#allocation5 + $0x8] sm:$0xff] }
  0x38   :  { %v138_v17 = vmax.f32 %v134_v0, 0.0  ;;  %v140_v18 = vmul.f32 %v136_v14, %v134_v0  ;;  %v139_v21 = vmax.f32 %v135_v1, 0.0  ;;  %v141_v22 = vmul.f32 %v137_v15, %v135_v1  ;;  %v172_v33 = vld [vmem:[#allocation7] sm:$0xff]  ;;  %v173_v36 = vld [vmem:[#allocation7 + $0x8] sm:$0xff]  ;;  %s206_s21 = sshll.u32 %s330_s2, 4  ;;  %s207_s21 = int_to_ptr.vmem [resolvable:$true] %s206_s21 }
  0x39   :  { %v146_v4 = vsub.f32 0.0, %v144_v2  ;;  %v147_v5 = vsub.f32 0.0, %v145_v3  ;;  %s297_s22 = scalar_lea.vmem %s207_s21, 128  ;;  %p302_p11 = scmp.lt.s32.totalorder %s207_s21, %s207_s21 }
  0x3a   :  { %v142_v26 = vsub.f32 %v138_v17, %v140_v18  ;;  %v143_v29 = vsub.f32 %v139_v21, %v141_v22  ;;  %p298_p10 = scmp.ne.s32.totalorder %s207_s21, %s297_s22  ;;  %p303_p12 = scmp.lt.s32.totalorder %s297_s22, %s297_s22 }
  0x3b   :  { %v148_v6 = vmul.f32 1.442695, %v146_v4  ;;  %v150_v7 = vmul.f32 1.442695, %v147_v5 }
  0x3c   :  { %p304_p13 = por %p303_p12, %p302_p11 }
  0x3d   :  { %223 = vpow2.f32 %v148_v6 }
  0x3e   :  { %225 = vpow2.f32 %v150_v7  ;;  %p305_p0 = pnand %p304_p13, %p298_p10 }
  0x47   :  { %v224_v8 = vpop.eup %223 }
  0x48   :  { %v226_v9 = vpop.eup %225  ;;  %v152_v10 = vadd.f32 1.0, %v224_v8  ;;  %v155_v12 = vmul.f32 -0.5, %v224_v8  ;;  %v158_v19 = vand.u32 2147483647, %v224_v8 }
  0x49   :  { %v161_v11 = vadd.f32 1.0, %v226_v9  ;;  %v164_v13 = vmul.f32 -0.5, %v226_v9  ;;  %v167_v23 = vand.u32 2147483647, %v226_v9 }
  0x4a   :  { %227 = vlog2.f32 %v152_v10  ;;  %v156_v16 = vadd.f32 1.0, %v155_v12  ;;  %vm159_vm0 = vcmp.lt.f32.partialorder %v158_v19, 0.0004427343 }
  0x4b   :  { %229 = vlog2.f32 %v161_v11  ;;  %v165_v20 = vadd.f32 1.0, %v164_v13  ;;  %vm168_vm1 = vcmp.lt.f32.partialorder %v167_v23, 0.0004427343 }
  0x4c   :  { %v157_v24 = vmul.f32 %v224_v8, %v156_v16 }
  0x4d   :  { %v166_v27 = vmul.f32 %v226_v9, %v165_v20 }
  0x54   :  { %v228_v25 = vpop.eup %227 }
  0x55   :  { %v230_v28 = vpop.eup %229  ;;  %v154_v30 = vmul.f32 0.6931472, %v228_v25 }
  0x56   :  { %v163_v31 = vmul.f32 0.6931472, %v230_v28 }
  0x57   :  { %v160_v32 = vsel %vm159_vm0, %v157_v24, %v154_v30 }
  0x58   :  { %v169_v34 = vsel %vm168_vm1, %v166_v27, %v163_v31  ;;  %v170_v35 = vadd.f32 %v160_v32, %v142_v26 }
  0x59   :  { %v171_v37 = vadd.f32 %v169_v34, %v143_v29 }
  0x5a   :  { %v174_v38 = vmul.f32 %v172_v33, %v170_v35 }
  0x5b   :  { %v175_v39 = vmul.f32 %v173_v36, %v171_v37 }
  0x5d   :  { %v197_v40 = vadd.f32 %v175_v39, %v174_v38 }
  0x5f   :  { %199 = vst [vmem:[#allocation8] sm:$0xff] %v197_v40 }
  0x60   :  { %308 = shalt.err (!%p305_p0)
}
  0x61   :  { %s309_s25 = scalar_lea.hbm %s418_s3, 128 }
  0x62   :  { %p310_p1 = scmp.ne.s32.totalorder %s418_s3, %s309_s25  ;;  %p313_p2 = scmp.lt.u32.totalorder %s309_s25, %s418_s3 }
  0x64   :  { %p315_p3 = pnand %p313_p2, %p310_p1 }
  0x66   :  { %318 = shalt.err (!%p315_p3)
}
  0x67   :  { %209 = dma.vmem_to_hbm [thread:$0]  %s207_s21, 128, %s418_s3, [#allocation4]  }
  0x68   :  { %323 = dma.done.wait [#allocation4], 128  }
  0x69   :  { %324 = vsyncadd [#allocation4], 4294967168 }
  0x6a   :  { %213 = vsyncpa [#allocation3], 1 }
  0x6b   :  { %214 = vsyncpa [#allocation6], 1 }
  0x6c   :  { %215 = vsyncpa [#allocation4], 1 }

</bundles_post_ra>
